<compile_context>
chip_gen: v7x
topology: tpu7x:2x2x1
jax: 0.10.0
libtpu: 0.0.40
codegen_flags: <defaults>
</compile_context>

<pallas_src>
import math
from functools import partial

import jax
import jax.numpy as jnp
from jax.experimental import pallas as pl
from jax.experimental.pallas import tpu as pltpu


IN_DIM = 5
OUT_DIM = 3
LANE = 128          # TPU lane width
TB_MAX = 512        # max batch-tile (columns) per grid step (spill-free at H=32)


def _cdiv(a, b):
    return -(-a // b)


def make_pi_kernel(in_dim, h1, h2, out_dim):
    """Kernel factory closing over the static layer sizes."""
    r1 = h1            # end row of layer-1 block in the packed param buffer
    r2 = h1 + h2       # end row of layer-2 block

    def pi_kernel(p_ref, x_ref, o_ref):
        # x tile straight from HBM: [TB, in_dim], batch-major (no wrapper relayout).
        x = x_ref[...]

        # ---- fc1 + relu : contract the feature dim of both operands
        #      [h1, in_dim] x [TB, in_dim] -> [h1, TB]   (mean-centering folded in W1)
        w1 = p_ref[0:r1, 0:in_dim]
        b1 = p_ref[0:r1, in_dim:in_dim + 1]                 # [h1, 1]
        h = jax.lax.dot_general(
            w1, x, dimension_numbers=(((1,), (1,)), ((), ())),
            preferred_element_type=jnp.float32) + b1
        h = jnp.maximum(h, 0.0)

        # ---- fc2 + relu : [h2, h1] @ [h1, TB] -> [h2, TB]
        w2 = p_ref[r1:r2, 0:h1]
        b2 = p_ref[r1:r2, h1:h1 + 1]                        # [h2, 1]
        h = jnp.dot(w2, h, preferred_element_type=jnp.float32) + b2
        h = jnp.maximum(h, 0.0)

        # ---- fc3 : [out_dim, h2] @ [h2, TB] -> [out_dim, TB]
        w3 = p_ref[r2:r2 + out_dim, 0:h2]
        b3 = p_ref[r2:r2 + out_dim, h2:h2 + 1]              # [out_dim, 1]
        z = jnp.dot(w3, h, preferred_element_type=jnp.float32) + b3

        # ---- softmax over the feature axis (axis 0); columns (samples) independent.
        z = z - jnp.max(z, axis=0, keepdims=True)
        e = jnp.exp(z)
        o_ref[...] = (e / jnp.sum(e, axis=0, keepdims=True)).astype(o_ref.dtype)

    return pi_kernel


def pack_pi_params(params):
    """Pack all weights/biases into a single f32 buffer (done ONCE per param set).

    Row layout:   [0,      H1)      -> fc1   (weight cols [0,5),  bias col 5)
                  [H1,     H1+H2)   -> fc2   (weight cols [0,H1), bias col H1)
                  [H1+H2,  H1+H2+3) -> fc3   (weight cols [0,H2), bias col H2)

    The per-sample mean-centering of the input is folded into fc1:
        W1 (x - mean(x)*1) == (W1 - rowmean(W1)*1^T) x    (exact).
    """
    w1, b1 = params["w1"], params["b1"]
    w2, b2 = params["w2"], params["b2"]
    w3, b3 = params["w3"], params["b3"]
    h1, in_dim = w1.shape
    h2 = w2.shape[0]
    out_dim = w3.shape[0]

    w1c = w1 - jnp.mean(w1, axis=1, keepdims=True)   # fold centering into fc1 weight

    cols = max(in_dim, h1, h2) + 1
    rows = h1 + h2 + out_dim
    buf = jnp.zeros((rows, cols), jnp.float32)
    buf = buf.at[0:h1, 0:in_dim].set(w1c.astype(jnp.float32))
    buf = buf.at[0:h1, in_dim].set(b1)
    buf = buf.at[h1:h1 + h2, 0:h1].set(w2)
    buf = buf.at[h1:h1 + h2, h1].set(b2)
    buf = buf.at[h1 + h2:, 0:h2].set(w3)
    buf = buf.at[h1 + h2:, h2].set(b3)
    return buf


@partial(jax.jit, static_argnames=("h1", "h2"))
def pi_forward(x, packed, *, h1, h2):
    """x: [B, 5] float32.  packed: pre-packed param buffer from pack_pi_params."""
    B, in_dim = x.shape
    out_dim = packed.shape[0] - h1 - h2

    # --- batch tiling: lane-multiple tiles; even grid length (>1) so the
    #     "parallel" batch axis load-balances across v7x's two TensorCores.
    lanes = _cdiv(B, LANE)
    tiles = _cdiv(lanes, TB_MAX // LANE)
    if tiles > 1 and tiles % 2 == 1:
        tiles += 1
    tb_lanes = _cdiv(lanes, tiles)
    TB = tb_lanes * LANE
    grid = tiles
    B_pad = grid * TB

    x = x.astype(jnp.float32)
    if B_pad != B:
        # Only the ragged tail is zero-padded; fuses under jit (no transpose pass).
        x = jnp.pad(x, ((0, B_pad - B), (0, 0)))

    kernel = make_pi_kernel(in_dim, h1, h2, out_dim)

    yT = pl.pallas_call(
        kernel,
        out_shape=jax.ShapeDtypeStruct((out_dim, B_pad), jnp.float32),
        grid_spec=pltpu.PrefetchScalarGridSpec(
            num_scalar_prefetch=0,
            grid=(grid,),
            in_specs=[
                # packed params: one full block, same for every step -> single DMA
                pl.BlockSpec(packed.shape, lambda i: (0, 0)),
                # x: native batch-major [TB, 5] tiles
                pl.BlockSpec((TB, in_dim), lambda i: (i, 0)),
            ],
            # feature-major output -> lane-dense stores
            out_specs=pl.BlockSpec((out_dim, TB), lambda i: (0, i)),
        ),
        compiler_params=pltpu.CompilerParams(
            dimension_semantics=("parallel",)),   # shards batch tiles across TCs (v7x)
    )(packed, x)

    # Strip padding and return batch-major [B, 3] (tiny; fused under jit).
    return jnp.transpose(yT[:, :B])


def init_pi_params(key, dim_hidden1, dim_hidden2):
    """Deterministic init mirroring the PyTorch module's __init__.

    fanin_ uses size[0] of the torch weight (= out_features) as the fan-in,
    faithfully reproducing the original (quirky) code.  Weights are kept in
    torch layout [out, in]; biases are 1-D [out].
    """
    ks = jax.random.split(key, 6)

    w1_bound = 2.0 / math.sqrt(dim_hidden1)
    w1 = jax.random.uniform(ks[0], (dim_hidden1, 5), jnp.float32,
                            -w1_bound, w1_bound)
    b1_bound = 1.0 / math.sqrt(5)
    b1 = jax.random.uniform(ks[1], (dim_hidden1,), jnp.float32,
                            -b1_bound, b1_bound)

    w2_bound = 2.0 / math.sqrt(dim_hidden2)
    w2 = jax.random.uniform(ks[2], (dim_hidden2, dim_hidden1), jnp.float32,
                            -w2_bound, w2_bound)
    b2_bound = 1.0 / math.sqrt(dim_hidden1)
    b2 = jax.random.uniform(ks[3], (dim_hidden2,), jnp.float32,
                            -b2_bound, b2_bound)

    w3 = jax.random.uniform(ks[4], (3, dim_hidden2), jnp.float32,
                            -0.003, 0.003)
    b3_bound = 1.0 / math.sqrt(dim_hidden2)
    b3 = jax.random.uniform(ks[5], (3,), jnp.float32, -b3_bound, b3_bound)

    return {"w1": w1, "b1": b1, "w2": w2, "b2": b2, "w3": w3, "b3": b3}


def pi_reference(x, params):
    """Pure-JAX reference for validation (mirrors the PyTorch forward)."""
    x = x - jnp.mean(x, axis=1, keepdims=True)
    h = jax.nn.relu(x @ params["w1"].T + params["b1"])
    h = jax.nn.relu(h @ params["w2"].T + params["b2"])
    z = h @ params["w3"].T + params["b3"]
    return jax.nn.softmax(z, axis=1)


if __name__ == "__main__":
    key = jax.random.PRNGKey(0)
    k_x, k_x2, k_p = jax.random.split(key, 3)

    dim_hidden1 = 32
    dim_hidden2 = 32
    params = init_pi_params(k_p, dim_hidden1, dim_hidden2)
    packed = pack_pi_params(params)   # pack ONCE (centering folded into W1), reuse

    # Small-batch case (single tile, exercises batch padding 8 -> 128 lanes).
    batch = 8
    x = jax.random.normal(k_x, (batch, 5), dtype=jnp.float32)
    out = jax.block_until_ready(
        pi_forward(x, packed, h1=dim_hidden1, h2=dim_hidden2))
    ref = pi_reference(x, params)
    assert out.shape == (batch, 3)
    assert jnp.allclose(out, ref, atol=2e-3, rtol=2e-3), "mismatch vs reference (B=8)"
    assert jnp.allclose(jnp.sum(out, axis=1), jnp.ones((batch,)), atol=1e-3)

    # Multi-tile case: even grid (6 tiles of 384) -> balanced across v7x's 2 TCs,
    # no batch padding, no wrapper-side transpose of x.
    batch2 = 2304
    x2 = jax.random.normal(k_x2, (batch2, 5), dtype=jnp.float32)
    out2 = jax.block_until_ready(
        pi_forward(x2, packed, h1=dim_hidden1, h2=dim_hidden2))
    ref2 = pi_reference(x2, params)
    assert out2.shape == (batch2, 3)
    assert jnp.allclose(out2, ref2, atol=2e-3, rtol=2e-3), "mismatch vs reference (B=2304)"
    assert jnp.allclose(jnp.sum(out2, axis=1), jnp.ones((batch2,)), atol=1e-3)

    print("KERNEL_OK")
</pallas_src>

<mosaic_0001>
module attributes {stable_mosaic.version = 11 : i64} {
  func.func @pi_kernel(%arg0: i32, %arg1: memref<67x33xf32, #tpu.memory_space<vmem>>, %arg2: memref<128x5xf32, #tpu.memory_space<vmem>>, %arg3: memref<3x128xf32, #tpu.memory_space<vmem>>) attributes {dimension_semantics = [#tpu.dimension_semantics<parallel>], iteration_bounds = array<i64: 1>, scalar_prefetch = 0 : i64, scratch_operands = 0 : i64, tpu.core_type = #tpu.core_type<tc>, window_params = [{pipeline_mode = #tpu.pipeline_mode<synchronous>, transform_indices = @transform_0, window_bounds = array<i64: 67, 33>}, {transform_indices = @transform_1, window_bounds = array<i64: 128, 5>}, {transform_indices = @transform_2, window_bounds = array<i64: 3, 128>}]} {
    %c0 = arith.constant 0 : index
    %c0_0 = arith.constant 0 : index
    %0 = vector.load %arg2[%c0, %c0_0] : memref<128x5xf32, #tpu.memory_space<vmem>>, vector<128x5xf32>
    %c0_1 = arith.constant 0 : index
    %c0_2 = arith.constant 0 : index
    %1 = vector.load %arg1[%c0_1, %c0_2] : memref<67x33xf32, #tpu.memory_space<vmem>>, vector<32x5xf32>
    %c0_3 = arith.constant 0 : index
    %c5 = arith.constant 5 : index
    %2 = vector.load %arg1[%c0_3, %c5] : memref<67x33xf32, #tpu.memory_space<vmem>>, vector<32x1xf32>
    %cst = arith.constant dense<0.000000e+00> : vector<32x128xf32>
    %3 = tpu.matmul %1, %0, %cst {dimension_numbers = #tpu.dot_dimension_numbers<[1], [1], [0], [0], [0, 0, 1, 0], [], []>} : vector<32x5xf32>, vector<128x5xf32>, vector<32x128xf32> -> vector<32x128xf32>
    %4 = vector.broadcast %2 : vector<32x1xf32> to vector<32x128xf32>
    %5 = arith.addf %3, %4 : vector<32x128xf32>
    %cst_4 = arith.constant 0.000000e+00 : f32
    %6 = vector.broadcast %cst_4 : f32 to vector<32x128xf32>
    %7 = arith.maximumf %5, %6 : vector<32x128xf32>
    %c32 = arith.constant 32 : index
    %c0_5 = arith.constant 0 : index
    %8 = vector.load %arg1[%c32, %c0_5] : memref<67x33xf32, #tpu.memory_space<vmem>>, vector<32x32xf32>
    %c32_6 = arith.constant 32 : index
    %c32_7 = arith.constant 32 : index
    %9 = vector.load %arg1[%c32_6, %c32_7] : memref<67x33xf32, #tpu.memory_space<vmem>>, vector<32x1xf32>
    %cst_8 = arith.constant dense<0.000000e+00> : vector<32x128xf32>
    %10 = tpu.matmul %8, %7, %cst_8 {dimension_numbers = #tpu.dot_dimension_numbers<[1], [0], [0], [1], [0, 0, 1, 1], [], []>} : vector<32x32xf32>, vector<32x128xf32>, vector<32x128xf32> -> vector<32x128xf32>
    %11 = vector.broadcast %9 : vector<32x1xf32> to vector<32x128xf32>
    %12 = arith.addf %10, %11 : vector<32x128xf32>
    %cst_9 = arith.constant 0.000000e+00 : f32
    %13 = vector.broadcast %cst_9 : f32 to vector<32x128xf32>
    %14 = arith.maximumf %12, %13 : vector<32x128xf32>
    %c64 = arith.constant 64 : index
    %c0_10 = arith.constant 0 : index
    %15 = vector.load %arg1[%c64, %c0_10] : memref<67x33xf32, #tpu.memory_space<vmem>>, vector<3x32xf32>
    %c64_11 = arith.constant 64 : index
    %c32_12 = arith.constant 32 : index
    %16 = vector.load %arg1[%c64_11, %c32_12] : memref<67x33xf32, #tpu.memory_space<vmem>>, vector<3x1xf32>
    %cst_13 = arith.constant dense<0.000000e+00> : vector<3x128xf32>
    %17 = tpu.matmul %15, %14, %cst_13 {dimension_numbers = #tpu.dot_dimension_numbers<[1], [0], [0], [1], [0, 0, 1, 1], [], []>} : vector<3x32xf32>, vector<32x128xf32>, vector<3x128xf32> -> vector<3x128xf32>
    %18 = vector.broadcast %16 : vector<3x1xf32> to vector<3x128xf32>
    %19 = arith.addf %17, %18 : vector<3x128xf32>
    %cst_14 = arith.constant dense<0xFF800000> : vector<128xf32>
    %20 = vector.multi_reduction <maximumf>, %19, %cst_14 [0] : vector<3x128xf32> to vector<128xf32>
    %21 = vector.shape_cast %20 : vector<128xf32> to vector<1x128xf32>
    %22 = vector.broadcast %21 : vector<1x128xf32> to vector<3x128xf32>
    %23 = arith.subf %19, %22 : vector<3x128xf32>
    %24 = math.exp %23 : vector<3x128xf32>
    %cst_15 = arith.constant dense<0.000000e+00> : vector<128xf32>
    %25 = vector.multi_reduction <add>, %24, %cst_15 [0] : vector<3x128xf32> to vector<128xf32>
    %26 = vector.shape_cast %25 : vector<128xf32> to vector<1x128xf32>
    %27 = vector.broadcast %26 : vector<1x128xf32> to vector<3x128xf32>
    %28 = arith.divf %24, %27 : vector<3x128xf32>
    %c0_16 = arith.constant 0 : index
    %c0_17 = arith.constant 0 : index
    %29 = vector.load %arg3[%c0_16, %c0_17] : memref<3x128xf32, #tpu.memory_space<vmem>>, vector<3x128xf32>
    tpu.vector_store %arg3[%c0_16, %c0_17], %28 {strides = array<i32>} : memref<3x128xf32, #tpu.memory_space<vmem>>, vector<3x128xf32>,
    return
  }
  func.func @transform_0(%arg0: i32) -> (i32, i32) {
    %c0_i32 = arith.constant 0 : i32
    %c0_i32_0 = arith.constant 0 : i32
    %c0_i32_1 = arith.constant 0 : i32
    return %c0_i32, %c0_i32_0 : i32, i32
  }
  func.func @transform_1(%arg0: i32) -> (i32, i32) {
    %c0_i32 = arith.constant 0 : i32
    %c0_i32_0 = arith.constant 0 : i32
    return %arg0, %c0_i32 : i32, i32
  }
  func.func @transform_2(%arg0: i32) -> (i32, i32) {
    %c0_i32 = arith.constant 0 : i32
    %c0_i32_0 = arith.constant 0 : i32
    return %c0_i32, %arg0 : i32, i32
  }
}

</mosaic_0001>

<bundles_post_ra>
// kernel: pi_forward.1
= control target key start
LH: loop header
LB: loop body
LE: loop exit
PB: predicated region body
PF: predicated region fallthrough
CT: control target
= control target key end

     0   :  { %vm51_vm0 = vcmask 39936   ;;  %v618_v3 = vmov 5   ;;  %vm221_vm2 = vcmask 261120   ;;  %v619_v32 = vmov 32   ;;  %s763_s1 = inlined_call_operand.vmem [shape: f32[128,5], index: 1, kind: input, shape index: {}]   ;;  %s764_s0 = inlined_call_operand.vmem [shape: f32[67,33], index: 0, kind: input, shape index: {}]   ;;  %s765_s2 = inlined_call_operand.vmem [shape: f32[3,128], index: 2, kind: output, shape index: {}]  }
   0x1   :  { %v11_v0 = vld [vmem:[%s763_s1] sm:$0xff]  ;;  %v12_v1 = vld [vmem:[%s763_s1 + $0x8] sm:$0xff]  ;;  %vm646_vm1 = vmpackc.low %vm51_vm0, %vm51_vm0  ;;  %610 = vset.pattern.permute.xlu0 %v618_v3  ;;  %611 = vset.pattern.permute.xlu1 %v618_v3  ;;  %v620_v54 = vmov 0.0|0.0   ;;  %vm621_vm3 = vmmov 0   ;;  %v622_v55 = vmov 0.0   ;;  %vm397_vm4 = vcmask 1042432  }
   0x2   :  { %v543_v4 = vpack.c.bf16 %v12_v1, %v11_v0  ;;  %v13_v5 = vld [vmem:[%s763_s1 + $0x10] sm:$0xff]  ;;  %v14_v6 = vld [vmem:[%s763_s1 + $0x18] sm:$0xff]  ;;  %v27_v8 = vld [vmem:[%s764_s0] sm:$0xff] }
   0x3   :  { %v549_v7 = vpack.c.bf16 %v14_v6, %v13_v5  ;;  %v15_v9 = vld [vmem:[%s763_s1 + $0x20] sm:$0xff]  ;;  %v16_v10 = vld [vmem:[%s763_s1 + $0x28] sm:$0xff]  ;;  %512 = vmatprep.mubr.msk.f32.mxu0 %vm51_vm0, %v27_v8  ;;  %v29_v11 = vld [vmem:[%s764_s0 + $0x10] sm:$0xff]  ;;  %33 = vperm.xlu0 %610, %v27_v8  }
   0x4   :  { %545 = vmatprep.subr.msk.bf16.mxu0 %vm646_vm1, %v543_v4  ;;  %43 = vperm.xlu1 %611, %v29_v11   ;;  %v555_v12 = vpack.c.bf16 %v16_v10, %v15_v9  ;;  %v28_v13 = vld [vmem:[%s764_s0 + $0x8] sm:$0xff]  ;;  %v30_v14 = vld [vmem:[%s764_s0 + $0x18] sm:$0xff]  ;;  %v17_v15 = vld [vmem:[%s763_s1 + $0x30] sm:$0xff] }
   0x5   :  { %548 = vmatpush3.bf16.xpose.msk.msra.mxu0 %vm646_vm1, %v543_v4  ;;  %v18_v16 = vld [vmem:[%s763_s1 + $0x38] sm:$0xff]  ;;  %v19_v18 = vld [vmem:[%s763_s1 + $0x40] sm:$0xff]  ;;  %v20_v19 = vld [vmem:[%s763_s1 + $0x48] sm:$0xff] }
   0x6   :  { %551 = vmatprep.subr.msk.bf16.mxu0 %vm646_vm1, %v549_v7  ;;  %v561_v17 = vpack.c.bf16 %v18_v16, %v17_v15  ;;  %v567_v20 = vpack.c.bf16 %v20_v19, %v19_v18  ;;  %v21_v21 = vld [vmem:[%s763_s1 + $0x50] sm:$0xff]  ;;  %v22_v22 = vld [vmem:[%s763_s1 + $0x58] sm:$0xff]  ;;  %v23_v24 = vld [vmem:[%s763_s1 + $0x60] sm:$0xff] }
   0x7   :  { %38 = vperm.xlu0 %610, %v28_v13   ;;  %v573_v23 = vpack.c.bf16 %v22_v22, %v21_v21  ;;  %v24_v25 = vld [vmem:[%s763_s1 + $0x68] sm:$0xff]  ;;  %v25_v27 = vld [vmem:[%s763_s1 + $0x70] sm:$0xff]  ;;  %v26_v28 = vld [vmem:[%s763_s1 + $0x78] sm:$0xff] }
   0x8   :  { %48 = vperm.xlu1 %611, %v30_v14   ;;  %v579_v26 = vpack.c.bf16 %v24_v25, %v23_v24  ;;  %v585_v29 = vpack.c.bf16 %v26_v28, %v25_v27  ;;  %v197_v30 = vld [vmem:[%s764_s0 + $0x20] sm:$0xff]  ;;  %v198_v31 = vld [vmem:[%s764_s0 + $0x28] sm:$0xff]  ;;  %v199_v33 = vld [vmem:[%s764_s0 + $0x30] sm:$0xff] }
   0x9   :  { %526 = vmatprep.mubr.msk.f32.mxu1 %vm221_vm2, %v197_v30  ;;  %v200_v34 = vld [vmem:[%s764_s0 + $0x38] sm:$0xff]  ;;  %v319_v35 = vld [vmem:[%s764_s0 + $0x40] sm:$0x7] }
   0xb   :  { %612 = vset.pattern.permute.xlu0 %v619_v32 }
   0xc   :  { %613 = vset.pattern.permute.xlu1 %v619_v32  ;;  %203 = vperm.xlu0 %612, %v197_v30  }
   0xd   :  { %554 = vmatpush3.bf16.xpose.msk.msra.mxu0 %vm646_vm1, %v549_v7  ;;  %208 = vperm.xlu1 %613, %v198_v31  }
   0xe   :  { %557 = vmatprep.subr.msk.bf16.mxu0 %vm646_vm1, %v555_v12 }
  0x10   :  { %218 = vperm.xlu0 %612, %v200_v34  }
  0x11   :  { %213 = vperm.xlu1 %613, %v199_v33  }
  0x15   :  { %560 = vmatpush3.bf16.xpose.msk.msra.mxu0 %vm646_vm1, %v555_v12  ;;  %322 = vperm.xlu1 %613, %v319_v35  }
  0x16   :  { %563 = vmatprep.subr.msk.bf16.mxu0 %vm646_vm1, %v561_v17 }
  0x1d   :  { %566 = vmatpush3.bf16.xpose.msk.msra.mxu0 %vm646_vm1, %v561_v17 }
  0x1e   :  { %569 = vmatprep.subr.msk.bf16.mxu0 %vm646_vm1, %v567_v20 }
  0x25   :  { %572 = vmatpush3.bf16.xpose.msk.msra.mxu0 %vm646_vm1, %v567_v20 }
  0x26   :  { %575 = vmatprep.subr.msk.bf16.mxu0 %vm646_vm1, %v573_v23 }
  0x2d   :  { %578 = vmatpush3.bf16.xpose.msk.msra.mxu0 %vm646_vm1, %v573_v23 }
  0x2e   :  { %581 = vmatprep.subr.msk.bf16.mxu0 %vm646_vm1, %v579_v26 }
  0x35   :  { %584 = vmatpush3.bf16.xpose.msk.msra.mxu0 %vm646_vm1, %v579_v26 }
  0x36   :  { %587 = vmatprep.subr.msk.bf16.mxu0 %vm646_vm1, %v585_v29 }
  0x3d   :  { %590 = vmatpush3.bf16.xpose.msk.msra.mxu0 %vm646_vm1, %v585_v29 }
  0x44   :  { %513 = vmatmul.mubr.msk.f32.vlgmr.msra.gmra.mrb[0].mxu0 %vm51_vm0, %v28_v13 }
  0x45   :  { %515 = vmatprep.mubr.msk.f32.mxu0 %vm51_vm0, %v29_v11 }
  0x48   :  { %516 = vmatmul.mubr.msk.f32.gmra.mrb[2].mxu0 %vm51_vm0, %v30_v14 }
  0x82   :  { %v34_v36 = vpop.permute.xlu0 %33 }
  0x83   :  { %v44_v37 = vpop.permute.xlu1 %43 }
  0x86   :  { %v39_v38 = vpop.permute.xlu0 %38 }
  0x87   :  { %v49_v44 = vpop.permute.xlu1 %48 }
  0x8b   :  { %v204_v56 = vpop.permute.xlu0 %203 }
  0x8c   :  { %v209_v57 = vpop.permute.xlu1 %208 }
  0x8f   :  { %v219_v63 = vpop.permute.xlu0 %218 }
  0x90   :  { %v214_v2 = vpop.permute.xlu1 %213 }
  0x94   :  { %v323_v10 = vpop.permute.xlu1 %322 }
 0x117   :  { %v514_v39 = vpop.f32.mrb[0].mxu0 }
 0x118   :  { %v180_v40 = vadd.f32 %v514_v39, %v39_v38  ;;  %v174_v41 = vpop.f32.mrb[1].mxu0 }
 0x119   :  { %v175_v42 = vadd.f32 %v174_v41, %v34_v36 }
 0x11a   :  { %v194_v43 = vmax.f32 %v180_v40, 0.0 }
 0x11b   :  { %v193_v45 = vmax.f32 %v175_v42, 0.0  ;;  %v517_v46 = vpop.f32.mrb[2].mxu0 }
 0x11c   :  { %v190_v47 = vadd.f32 %v517_v46, %v49_v44  ;;  %v184_v48 = vpop.f32.mrb[3].mxu0 }
 0x11d   :  { %v185_v49 = vadd.f32 %v184_v48, %v44_v37  ;;  %v591_v50 = vpack.c.bf16 %v194_v43, %v193_v45 }
 0x11e   :  { %v196_v51 = vmax.f32 %v190_v47, 0.0 }
 0x11f   :  { %v195_v52 = vmax.f32 %v185_v49, 0.0  ;;  %592 = vmatprep.subr.bf16.mxu1 %v591_v50 }
 0x120   :  { %594 = vmatpush3.bf16.msra.mxu1 %v591_v50 }
 0x121   :  { %v595_v53 = vpack.c.bf16 %v196_v51, %v195_v52 }
 0x123   :  { %596 = vmatprep.subr.bf16.mxu1 %v595_v53 }
 0x124   :  { %598 = vmatpush3.bf16.msra.mxu1 %v595_v53 }
 0x125   :  { %599 = vmatprep.subr.bf16.mxu1 %v620_v54 }
 0x127   :  { %527 = vmatmul.mubr.msk.f32.vlgmr.msra.gmra.mrb[0].mxu1 %vm221_vm2, %v198_v31 }
 0x128   :  { %529 = vmatprep.mubr.msk.f32.mxu1 %vm221_vm2, %v199_v33 }
 0x12b   :  { %530 = vmatmul.mubr.msk.f32.gmra.mrb[2].mxu1 %vm221_vm2, %v200_v34 }
 0x12c   :  { %540 = vmatprep.mubr.msk.f32.mxu1 %vm621_vm3, %v622_v55 }
 0x1fa   :  { %v528_v58 = vpop.f32.mrb[0].mxu1 }
 0x1fb   :  { %v302_v59 = vadd.f32 %v528_v58, %v209_v57  ;;  %v296_v60 = vpop.f32.mrb[1].mxu1 }
 0x1fc   :  { %v297_v61 = vadd.f32 %v296_v60, %v204_v56 }
 0x1fd   :  { %v316_v62 = vmax.f32 %v302_v59, 0.0 }
 0x1fe   :  { %v315_v0 = vmax.f32 %v297_v61, 0.0  ;;  %v531_v1 = vpop.f32.mrb[2].mxu1 }
 0x1ff   :  { %v312_v3 = vadd.f32 %v531_v1, %v219_v63  ;;  %v306_v4 = vpop.f32.mrb[3].mxu1 }
 0x200   :  { %v600_v5 = vpack.c.bf16 %v316_v62, %v315_v0  ;;  %v307_v6 = vadd.f32 %v306_v4, %v214_v2 }
 0x201   :  { %v318_v7 = vmax.f32 %v312_v3, 0.0 }
 0x202   :  { %v317_v8 = vmax.f32 %v307_v6, 0.0  ;;  %601 = vmatpush3.bf16.msra.mxu1 %v600_v5 }
 0x203   :  { %602 = vmatprep.subr.bf16.mxu1 %v620_v54 }
 0x204   :  { %v603_v9 = vpack.c.bf16 %v318_v7, %v317_v8 }
 0x206   :  { %604 = vmatpush3.bf16.msra.mxu1 %v603_v9 }
 0x209   :  { %541 = vmatmul.mubr.msk.f32.vlgmr.msra.gmra.mrb[4].mxu1 %vm221_vm2, %v319_v35 }
 0x2dc   :  { %v393_v11 = vpop.f32.mrb[4].mxu1 }
 0x2dd   :  { %v394_v12 = vadd.f32 %v393_v11, %v323_v10  ;;  %v542_v13 = vpop.f32.mrb[5].mxu1 }
 0x2df   :  { %v398_v14 = vsel %vm397_vm4, %v394_v12, -inf }
 0x2e0   :  { %v399_v15 = vrot.slane %v398_v14, 4 }
 0x2e2   :  { %v400_v16 = vmax.f32 %v398_v14, %v399_v15 }
 0x2e4   :  { %v401_v17 = vrot.slane %v400_v16, 2 }
 0x2e6   :  { %v402_v18 = vmax.f32 %v400_v16, %v401_v17 }
 0x2e8   :  { %v403_v19 = vrot.slane %v402_v18, 1 }
 0x2ea   :  { %v404_v20 = vmax.f32 %v402_v18, %v403_v19 }
 0x2ec   :  { %v405_v21 = vsub.f32 %v394_v12, %v404_v20 }
 0x2ee   :  { %v406_v22 = vmul.f32 1.442695, %v405_v21 }
 0x2f0   :  { %614 = vpow2.f32 %v406_v22 }
 0x2fa   :  { %v615_v23 = vpop.eup %614 }
 0x2fb   :  { %v408_v24 = vsel %vm397_vm4, %v615_v23, 0.0 }
 0x2fc   :  { %v409_v25 = vrot.slane %v408_v24, 4 }
 0x2fe   :  { %v410_v26 = vadd.f32 %v409_v25, %v408_v24 }
 0x300   :  { %v411_v27 = vrot.slane %v410_v26, 2 }
 0x302   :  { %v412_v28 = vadd.f32 %v411_v27, %v410_v26 }
 0x304   :  { %v413_v29 = vrot.slane %v412_v28, 1 }
 0x306   :  { %v414_v30 = vadd.f32 %v413_v29, %v412_v28 }
 0x308   :  { %616 = vrcp.f32 %v414_v30 }
 0x312   :  { %v617_v31 = vpop.eup %616 }
 0x313   :  { %v416_v32 = vmul.f32 %v617_v31, %v615_v23 }
 0x315   :  { %417 = vst [vmem:[%s765_s2] sm:$0x7] %v416_v32 }

</bundles_post_ra>
